<compile_context>
chip_gen: v7x
topology: tpu7x:2x2x1
jax: 0.10.0
libtpu: 0.0.40
codegen_flags: <defaults>
</compile_context>

<pallas_src>
import functools

import jax
import jax.numpy as jnp
from jax.experimental import pallas as pl
from jax.experimental.pallas import tpu as pltpu


_TILE_H = 512  # hidden-dim chunk for the small-batch (DMA-overlap) path


# ---------------------------------------------------------------------------
# Kernels
# ---------------------------------------------------------------------------
def _fc_kernel_resident(x_ref, w1_ref, b1_ref, w2_ref, b2_ref, o_ref, *, precision):
    """Full weights resident in VMEM; grid = (batch tiles,)."""
    x = x_ref[...].astype(w1_ref.dtype)
    h = jnp.dot(x, w1_ref[...],
                preferred_element_type=jnp.float32, precision=precision)
    h = jax.nn.sigmoid(h + b1_ref[...])                 # f32 bias add + EUP sigmoid
    y = jnp.dot(h.astype(w2_ref.dtype), w2_ref[...],
                preferred_element_type=jnp.float32, precision=precision)
    o_ref[...] = (y + b2_ref[...]).astype(o_ref.dtype)


def _fc_kernel_htiled(x_ref, w1_ref, b1_ref, w2_ref, b2_ref, o_ref, acc_ref,
                      *, precision):
    """Hidden dim streamed in chunks; grid = (batch tiles, H // tile_h).

    sigmoid is elementwise in H, so accumulating the partial second-matmul
    contributions over hidden chunks is exact.
    """
    k = pl.program_id(1)

    @pl.when(k == 0)
    def _():
        acc_ref[...] = jnp.zeros_like(acc_ref)

    x = x_ref[...].astype(w1_ref.dtype)
    h = jnp.dot(x, w1_ref[...],
                preferred_element_type=jnp.float32, precision=precision)
    h = jax.nn.sigmoid(h + b1_ref[...])
    acc_ref[...] += jnp.dot(h.astype(w2_ref.dtype), w2_ref[...],
                            preferred_element_type=jnp.float32,
                            precision=precision)

    @pl.when(k == pl.num_programs(1) - 1)
    def _():
        o_ref[...] = (acc_ref[...] + b2_ref[...]).astype(o_ref.dtype)


# ---------------------------------------------------------------------------
# One-time parameter preprocessing (hoisted out of the per-call hot path)
# ---------------------------------------------------------------------------
def prepare_params(w1_t, b1, w2_t, b2, weights_dtype=jnp.bfloat16):
    """w1_t: (F, H), b1: (H,), w2_t: (H, F), b2: (F,)  (transposed vs PyTorch).

    Casts weights to `weights_dtype` and zero-pads the OUTPUT feature dim of
    W2 / b2 to the next multiple of 128 so output stores are lane-dense.
    """
    F, H = w1_t.shape
    Fp = 128 * pl.cdiv(F, 128)
    pad_f = Fp - F
    w1_p = w1_t.astype(weights_dtype)                         # (F, H), F can stay 257
    b1_p = b1.reshape(1, H).astype(jnp.float32)
    w2_p = jnp.pad(w2_t, ((0, 0), (0, pad_f))).astype(weights_dtype)   # (H, Fp)
    b2_p = jnp.pad(b2, (0, pad_f)).reshape(1, Fp).astype(jnp.float32)  # (1, Fp)
    return w1_p, b1_p, w2_p, b2_p


def _choose_block_b(B):
    if B <= 64:
        return 8 * pl.cdiv(B, 8)                # one tile, at most 7 pad rows
    max_tile = 512 if B >= 2048 else 256        # bigger tiles only at large B
    n_steps = max(2, pl.cdiv(B, max_tile))      # >=2 steps -> v7x megacore shards
    return 8 * pl.cdiv(pl.cdiv(B, n_steps), 8)  # balanced tiles, minimal padding


# ---------------------------------------------------------------------------
# Forward pass
# ---------------------------------------------------------------------------
@jax.jit
def fc_layer_single_frame(x, w1_p, b1_p, w2_p, b2_p):
    """x: (B, F) f32.  Params from prepare_params(): (F,H) (1,H) (H,Fp) (1,Fp)."""
    B, F = x.shape
    H = w1_p.shape[1]
    Fp = w2_p.shape[1]

    # bf16 weights -> single-pass MXU; f32 weights -> 3-pass bf16 (HIGH), not 6.
    precision = (jax.lax.Precision.HIGH if w1_p.dtype == jnp.float32
                 else jax.lax.Precision.DEFAULT)

    block_b = _choose_block_b(B)
    pad_b = (-B) % block_b
    if pad_b:
        x = jnp.pad(x, ((0, pad_b), (0, 0)))    # batch pad only; F stays unpadded
    Bp = B + pad_b
    grid_b = Bp // block_b

    resident = pl.Buffered(1)                   # constant-index blocks: 1 buffer
    cp_kwargs = dict(vmem_limit_bytes=24 * 1024 * 1024)

    if grid_b <= 2:
        # Latency regime: stream H in chunks so weight DMA overlaps compute.
        tile_h = _TILE_H if H % _TILE_H == 0 else H
        grid_h = H // tile_h
        out = pl.pallas_call(
            functools.partial(_fc_kernel_htiled, precision=precision),
            out_shape=jax.ShapeDtypeStruct((Bp, Fp), jnp.float32),
            grid=(grid_b, grid_h),
            in_specs=[
                pl.BlockSpec((block_b, F), lambda i, k: (i, 0)),          # x
                pl.BlockSpec((F, tile_h), lambda i, k: (0, k)),           # W1^T chunk
                pl.BlockSpec((1, tile_h), lambda i, k: (0, k)),           # b1 chunk
                pl.BlockSpec((tile_h, Fp), lambda i, k: (k, 0)),          # W2^T chunk
                pl.BlockSpec((1, Fp), lambda i, k: (0, 0),
                             pipeline_mode=resident),                      # b2
            ],
            out_specs=pl.BlockSpec((block_b, Fp), lambda i, k: (i, 0)),
            scratch_shapes=[pltpu.VMEM((block_b, Fp), jnp.float32)],
            compiler_params=pltpu.CompilerParams(
                dimension_semantics=("parallel", "arbitrary"), **cp_kwargs),
        )(x, w1_p, b1_p, w2_p, b2_p)
    else:
        # Throughput regime: weights resident, tile only over batch.
        out = pl.pallas_call(
            functools.partial(_fc_kernel_resident, precision=precision),
            out_shape=jax.ShapeDtypeStruct((Bp, Fp), jnp.float32),
            grid=(grid_b,),
            in_specs=[
                pl.BlockSpec((block_b, F), lambda i: (i, 0)),             # x tile
                pl.BlockSpec((F, H), lambda i: (0, 0), pipeline_mode=resident),
                pl.BlockSpec((1, H), lambda i: (0, 0), pipeline_mode=resident),
                pl.BlockSpec((H, Fp), lambda i: (0, 0), pipeline_mode=resident),
                pl.BlockSpec((1, Fp), lambda i: (0, 0), pipeline_mode=resident),
            ],
            out_specs=pl.BlockSpec((block_b, Fp), lambda i: (i, 0)),
            compiler_params=pltpu.CompilerParams(
                dimension_semantics=("parallel",), **cp_kwargs),
        )(x, w1_p, b1_p, w2_p, b2_p)

    return out[:B, :F]


# ---------------------------------------------------------------------------
# Init + references
# ---------------------------------------------------------------------------
def init_params(key, n_features=257, hidden=2048):
    """Deterministic init mimicking nn.Linear's U(-1/sqrt(fan_in), 1/sqrt(fan_in))."""
    k1, k2, k3, k4 = jax.random.split(key, 4)
    bound1 = 1.0 / jnp.sqrt(n_features)
    bound2 = 1.0 / jnp.sqrt(hidden)
    w1_t = jax.random.uniform(k1, (n_features, hidden), jnp.float32, -bound1, bound1)
    b1 = jax.random.uniform(k2, (hidden,), jnp.float32, -bound1, bound1)
    w2_t = jax.random.uniform(k3, (hidden, n_features), jnp.float32, -bound2, bound2)
    b2 = jax.random.uniform(k4, (n_features,), jnp.float32, -bound2, bound2)
    return w1_t, b1, w2_t, b2


def reference_f32(x, w1_t, b1, w2_t, b2):
    hi = jax.lax.Precision.HIGHEST
    h = jax.nn.sigmoid(jnp.dot(x, w1_t, precision=hi) + b1)
    return jnp.dot(h, w2_t, precision=hi) + b2


def reference_bf16(x, w1_t, b1, w2_t, b2):
    """Same arithmetic as the bf16-weight kernel (bf16 MXU inputs, f32 accum)."""
    h = jnp.dot(x.astype(jnp.bfloat16), w1_t.astype(jnp.bfloat16),
                preferred_element_type=jnp.float32) + b1
    h = jax.nn.sigmoid(h)
    return jnp.dot(h.astype(jnp.bfloat16), w2_t.astype(jnp.bfloat16),
                   preferred_element_type=jnp.float32) + b2


if __name__ == "__main__":
    key = jax.random.PRNGKey(0)
    kx, kp = jax.random.split(key)

    n_features = 257   # single-frame LPS feature dim (module default)
    hidden = 2048
    batch = 8          # small batch of single frames

    x = jax.random.normal(kx, (batch, n_features), jnp.float32)
    w1_t, b1, w2_t, b2 = init_params(kp, n_features, hidden)

    # --- default bf16-weight path (small batch -> H-chunked pipeline) --------
    params_bf16 = prepare_params(w1_t, b1, w2_t, b2, weights_dtype=jnp.bfloat16)
    out = jax.block_until_ready(fc_layer_single_frame(x, *params_bf16))
    assert out.shape == (batch, n_features)
    ref_bf = reference_bf16(x, w1_t, b1, w2_t, b2)
    ref_f32 = reference_f32(x, w1_t, b1, w2_t, b2)
    assert jnp.allclose(out, ref_bf, atol=1e-2, rtol=1e-2), "bf16 kernel vs bf16 ref"
    # bf16 weights trade ~1e-3-level absolute error vs the f32 module output:
    assert jnp.allclose(out, ref_f32, atol=5e-2, rtol=5e-2), "bf16 kernel vs f32 ref"

    # --- opt-in f32-weight path (Precision.HIGH) ------------------------------
    params_f32 = prepare_params(w1_t, b1, w2_t, b2, weights_dtype=jnp.float32)
    out32 = jax.block_until_ready(fc_layer_single_frame(x, *params_f32))
    assert jnp.allclose(out32, ref_f32, atol=1e-4, rtol=1e-4), "f32 kernel vs f32 ref"

    # --- larger batch exercises the resident-weight / batch-tiled path --------
    xb = jax.random.normal(kx, (640, n_features), jnp.float32)
    outb = jax.block_until_ready(fc_layer_single_frame(xb, *params_bf16))
    assert outb.shape == (640, n_features)
    refb = reference_bf16(xb, w1_t, b1, w2_t, b2)
    assert jnp.allclose(outb, refb, atol=1e-2, rtol=1e-2), "resident path mismatch"

    print("KERNEL_OK")
</pallas_src>

<mosaic_0001>
module attributes {stable_mosaic.version = 11 : i64} {
  func.func @_fc_kernel_htiled(%arg0: i32, %arg1: i32, %arg2: memref<8x257xf32, #tpu.memory_space<vmem>>, %arg3: memref<257x512xbf16, #tpu.memory_space<vmem>>, %arg4: memref<1x512xf32, #tpu.memory_space<vmem>>, %arg5: memref<512x384xbf16, #tpu.memory_space<vmem>>, %arg6: memref<1x384xf32, #tpu.memory_space<vmem>>, %arg7: memref<8x384xf32, #tpu.memory_space<vmem>>, %arg8: memref<8x384xf32, #tpu.memory_space<vmem>>) attributes {dimension_semantics = [#tpu.dimension_semantics<parallel>, #tpu.dimension_semantics<arbitrary>], iteration_bounds = array<i64: 1, 4>, scalar_prefetch = 0 : i64, scratch_operands = 1 : i64, tpu.core_type = #tpu.core_type<tc>, window_params = [{transform_indices = @transform_0, window_bounds = array<i64: 8, 257>}, {transform_indices = @transform_1, window_bounds = array<i64: 257, 512>}, {transform_indices = @transform_2, window_bounds = array<i64: 1, 512>}, {transform_indices = @transform_3, window_bounds = array<i64: 512, 384>}, {pipeline_mode = #tpu.pipeline_mode<synchronous>, transform_indices = @transform_4, window_bounds = array<i64: 1, 384>}, {transform_indices = @transform_5, window_bounds = array<i64: 8, 384>}]} {
    %c0_i32 = arith.constant 0 : i32
    %0 = arith.cmpi eq, %arg1, %c0_i32 : i32
    %1 = arith.extui %0 : i1 to i32
    %c0_i32_0 = arith.constant 0 : i32
    %2 = arith.cmpi ne, %1, %c0_i32_0 : i32
    scf.if %2 {
      %cst_15 = arith.constant 0.000000e+00 : f32
      %24 = vector.broadcast %cst_15 : f32 to vector<8x384xf32>
      %c0_16 = arith.constant 0 : index
      %c0_17 = arith.constant 0 : index
      %25 = vector.load %arg8[%c0_16, %c0_17] : memref<8x384xf32, #tpu.memory_space<vmem>>, vector<8x384xf32>
      tpu.vector_store %arg8[%c0_16, %c0_17], %24 {strides = array<i32>} : memref<8x384xf32, #tpu.memory_space<vmem>>, vector<8x384xf32>,
    } else {
    }
    %c0 = arith.constant 0 : index
    %c0_1 = arith.constant 0 : index
    %3 = vector.load %arg2[%c0, %c0_1] : memref<8x257xf32, #tpu.memory_space<vmem>>, vector<8x257xf32>
    %4 = arith.truncf %3 : vector<8x257xf32> to vector<8x257xbf16>
    %c0_2 = arith.constant 0 : index
    %c0_3 = arith.constant 0 : index
    %5 = vector.load %arg3[%c0_2, %c0_3] : memref<257x512xbf16, #tpu.memory_space<vmem>>, vector<257x512xbf16>
    %cst = arith.constant dense<0.000000e+00> : vector<8x512xf32>
    %6 = tpu.matmul %4, %5, %cst {dimension_numbers = #tpu.dot_dimension_numbers<[1], [0], [0], [1], [0, 0, 1, 1], [], []>} : vector<8x257xbf16>, vector<257x512xbf16>, vector<8x512xf32> -> vector<8x512xf32>
    %c0_4 = arith.constant 0 : index
    %c0_5 = arith.constant 0 : index
    %7 = vector.load %arg4[%c0_4, %c0_5] : memref<1x512xf32, #tpu.memory_space<vmem>>, vector<1x512xf32>
    %8 = vector.broadcast %7 : vector<1x512xf32> to vector<8x512xf32>
    %9 = arith.addf %6, %8 : vector<8x512xf32>
    %10 = arith.negf %9 : vector<8x512xf32>
    %11 = math.exp %10 : vector<8x512xf32>
    %cst_6 = arith.constant 1.000000e+00 : f32
    %12 = vector.broadcast %cst_6 : f32 to vector<8x512xf32>
    %13 = arith.addf %12, %11 : vector<8x512xf32>
    %14 = arith.divf %12, %13 : vector<8x512xf32>
    %c0_7 = arith.constant 0 : index
    %c0_8 = arith.constant 0 : index
    %15 = vector.load %arg8[%c0_7, %c0_8] : memref<8x384xf32, #tpu.memory_space<vmem>>, vector<8x384xf32>
    %16 = arith.truncf %14 : vector<8x512xf32> to vector<8x512xbf16>
    %c0_9 = arith.constant 0 : index
    %c0_10 = arith.constant 0 : index
    %17 = vector.load %arg5[%c0_9, %c0_10] : memref<512x384xbf16, #tpu.memory_space<vmem>>, vector<512x384xbf16>
    %cst_11 = arith.constant dense<0.000000e+00> : vector<8x384xf32>
    %18 = tpu.matmul %16, %17, %cst_11 {dimension_numbers = #tpu.dot_dimension_numbers<[1], [0], [0], [1], [0, 0, 1, 1], [], []>} : vector<8x512xbf16>, vector<512x384xbf16>, vector<8x384xf32> -> vector<8x384xf32>
    %19 = arith.addf %15, %18 : vector<8x384xf32>
    %c0_12 = arith.constant 0 : index
    %c0_13 = arith.constant 0 : index
    %20 = vector.load %arg8[%c0_12, %c0_13] : memref<8x384xf32, #tpu.memory_space<vmem>>, vector<8x384xf32>
    tpu.vector_store %arg8[%c0_12, %c0_13], %19 {strides = array<i32>} : memref<8x384xf32, #tpu.memory_space<vmem>>, vector<8x384xf32>,
    %c3_i32 = arith.constant 3 : i32
    %21 = arith.cmpi eq, %arg1, %c3_i32 : i32
    %22 = arith.extui %21 : i1 to i32
    %c0_i32_14 = arith.constant 0 : i32
    %23 = arith.cmpi ne, %22, %c0_i32_14 : i32
    scf.if %23 {
      %c0_15 = arith.constant 0 : index
      %c0_16 = arith.constant 0 : index
      %24 = vector.load %arg8[%c0_15, %c0_16] : memref<8x384xf32, #tpu.memory_space<vmem>>, vector<8x384xf32>
      %c0_17 = arith.constant 0 : index
      %c0_18 = arith.constant 0 : index
      %25 = vector.load %arg6[%c0_17, %c0_18] : memref<1x384xf32, #tpu.memory_space<vmem>>, vector<1x384xf32>
      %26 = vector.broadcast %25 : vector<1x384xf32> to vector<8x384xf32>
      %27 = arith.addf %24, %26 : vector<8x384xf32>
      %c0_19 = arith.constant 0 : index
      %c0_20 = arith.constant 0 : index
      %28 = vector.load %arg7[%c0_19, %c0_20] : memref<8x384xf32, #tpu.memory_space<vmem>>, vector<8x384xf32>
      tpu.vector_store %arg7[%c0_19, %c0_20], %27 {strides = array<i32>} : memref<8x384xf32, #tpu.memory_space<vmem>>, vector<8x384xf32>,
    } else {
    }
    return
  }
  func.func @transform_0(%arg0: i32, %arg1: i32) -> (i32, i32) {
    %c0_i32 = arith.constant 0 : i32
    %c0_i32_0 = arith.constant 0 : i32
    return %arg0, %c0_i32 : i32, i32
  }
  func.func @transform_1(%arg0: i32, %arg1: i32) -> (i32, i32) {
    %c0_i32 = arith.constant 0 : i32
    %c0_i32_0 = arith.constant 0 : i32
    return %c0_i32, %arg1 : i32, i32
  }
  func.func @transform_2(%arg0: i32, %arg1: i32) -> (i32, i32) {
    %c0_i32 = arith.constant 0 : i32
    %c0_i32_0 = arith.constant 0 : i32
    return %c0_i32, %arg1 : i32, i32
  }
  func.func @transform_3(%arg0: i32, %arg1: i32) -> (i32, i32) {
    %c0_i32 = arith.constant 0 : i32
    %c0_i32_0 = arith.constant 0 : i32
    return %arg1, %c0_i32 : i32, i32
  }
  func.func @transform_4(%arg0: i32, %arg1: i32) -> (i32, i32) {
    %c0_i32 = arith.constant 0 : i32
    %c0_i32_0 = arith.constant 0 : i32
    %c0_i32_1 = arith.constant 0 : i32
    return %c0_i32, %c0_i32_0 : i32, i32
  }
  func.func @transform_5(%arg0: i32, %arg1: i32) -> (i32, i32) {
    %c0_i32 = arith.constant 0 : i32
    %c0_i32_0 = arith.constant 0 : i32
    return %arg0, %c0_i32 : i32, i32
  }
}

</mosaic_0001>

<bundles_post_ra>
// kernel: fc_layer_single_frame.1
= control target key start
LH: loop header
LB: loop body
LE: loop exit
PB: predicated region body
PF: predicated region fallthrough
CT: control target
= control target key end

     0   :  { %s3341_s0 = inlined_call_operand.hbm [shape: f32[8,257], index: 0, kind: input, shape index: {}]   ;;  %s3342_s1 = inlined_call_operand.hbm [shape: bf16[257,2048], index: 1, kind: input, shape index: {}]   ;;  %s3343_s2 = inlined_call_operand.hbm [shape: f32[1,2048], index: 2, kind: input, shape index: {}]   ;;  %s3344_s3 = inlined_call_operand.hbm [shape: bf16[2048,384], index: 3, kind: input, shape index: {}]   ;;  %s3345_s4 = inlined_call_operand.hbm [shape: f32[1,384], index: 4, kind: input, shape index: {}]   ;;  %s3346_s5 = inlined_call_operand.hbm [shape: f32[8,384], index: 5, kind: output, shape index: {}]  }
   0x1   :  { %3360 = sst [smem:[#allocation21_spill]] %s3342_s1 }
   0x2   :  { %3361 = sst [smem:[#allocation22_spill]] %s3345_s4 }
   0x3   :  { %10 = vsyncpa [#allocation4], 0 }
   0x4   :  { %11 = vsyncpa [#allocation7], 0 }
   0x5   :  { %13 = vsyncpa [#allocation7 + $0x1], 0 }
   0x6   :  { %14 = vsyncpa [#allocation10], 0 }
   0x7   :  { %16 = vsyncpa [#allocation10 + $0x1], 0 }
   0x8   :  { %17 = vsyncpa [#allocation5], 0  ;;  %s2864_s18 = smov 0   ;;  %s2866_s19 = smov 0  }
   0x9   :  { %s2868_s20 = smov 0   ;;  %s2870_s21 = smov 0  }
   0xa   :  { %s2872_s22 = smov 0   ;;  %s2874_s23 = smov 0  }
   0xb LB: > { %3362 = sst [smem:[#allocation18_spill]] %s2807_s20  ;;  %s2893_s24 = sadd.s32 4294967295, %s2819_s23   ;;  %s2819_s23 = sphi %s2874_s23, %s23_s23   ;;  %s2815_s22 = sphi %s2872_s22, %s3391_s22   ;;  %s2811_s21 = sphi %s2870_s21, %s3390_s21   ;;  %s2807_s20 = sphi %s2868_s20, %s3386_s20   ;;  %s2803_s19 = sphi %s2866_s19, %s3389_s19   ;;  %s2799_s18 = sphi %s2864_s18, %s3388_s18  }
   0xc   : > { %s68_s25 = sadd.s32 1, %s2807_s20  ;;  %p75_p0 = scmp.ne.s32.totalorder %s2807_s20, %s2803_s19 }
   0xd   : > { %p76_p1 = scmp.eq.s32.totalorder %s2819_s23, 0  ;;  %p81_p2 = scmp.ne.s32.totalorder %s2803_s19, %s2799_s18 }
   0xe   : > { %p3347_p3 = scmp.eq.s32.totalorder %s2893_s24, 0  ;;  %p1982_p5 = scmp.ge.s32.totalorder %s2819_s23, 1 }
   0xf   : > { %p77_p4 = por %p76_p1, %p75_p0  ;;  %p191_p7 = scmp.lt.s32.totalorder %s2819_s23, 5 }
  0x10   : > { %p2904_p6 = por %p3347_p3, %p81_p2  ;;  %s2821_s28 = smov [#allocation11]  }
  0x11   : > { %p2909_p8 = pnand %p1982_p5, %p191_p7  ;;  %s218_s29 = sshll.u32 %s2821_s28, 4  ;;  %s219_s29 = int_to_ptr.vmem [resolvable:$true] %s218_s29 }
  0x12   : > { %s3363_s26 = scalar_select %p2904_p6, 1, 0 }
  0x13   : > { %s3364_s27 = scalar_select %p2909_p8, 1, 0 }
  0x14   : > { %p2255_p9 = pneg %p2909_p8  ;;  %p2274_p10 = scmp.lt.s32.totalorder %s2819_s23, 4 }
  0x15   : > { %s3354_s30 = sand.u32 1, %s2819_s23   ;;  %s3367_s4 = sld [smem:[#allocation22_spill]] }
  0x16   : > { %p2919_p11 = pnand %p2255_p9, %p3347_p3  ;;  %p2923_p12 = pnand %p2274_p10, %p77_p4 }
  0x18   : > { %s3365_s6 = scalar_select %p2919_p11, 1, 0 }
  0x19   : > { %s3366_s7 = scalar_select %p2923_p12, 1, 0 }
  0x1a   : > { %p3351_p0 = pneg %p2919_p11 }
  0x1b   : > { %s2581_s10 = scalar_lea.hbm %s3367_s4, 48 }
  0x1c   : > { %p2582_p13 = scmp.ne.s32.totalorder %s3367_s4, %s2581_s10  ;;  %p2588_p4 = scmp.lt.u32.totalorder %s2581_s10, %s3367_s4 }
  0x1e   : > { %p2584_p1 = pnand %p3351_p0, %p2582_p13 }
  0x20   : > { %p2585_p2 = pneg %p2584_p1 }
  0x22   : > { %p2590_p5 = pnand %p2588_p4, %p2585_p2 }
  0x24   : > { %2593 = shalt.err (!%p2590_p5)
}
  0x25   : > { %s2594_s15 = scalar_lea.vmem %s219_s29, 48  ;;  %s2601_s16 = scalar_lea.vmem %s219_s29, 64 }
  0x26   : > { %p2595_p7 = scmp.ne.s32.totalorder %s219_s29, %s2594_s15  ;;  %p2602_p3 = scmp.lt.s32.totalorder %s219_s29, %s219_s29 }
  0x27   : > { %p2603_p6 = scmp.lt.s32.totalorder %s2601_s16, %s2594_s15 }
  0x28   : > { %p2597_p9 = pnand %p2595_p7, %p3351_p0 }
  0x29   : > { %p2604_p8 = por %p2603_p6, %p2602_p3 }
  0x2a   : > { %p2598_p10 = pneg %p2597_p9 }
  0x2c   : > { %p2605_p12 = pnand %p2604_p8, %p2598_p10 }
  0x2e   : > { %2608 = shalt.err (!%p2605_p12)
}
  0x2f   : > { %2261 = dma.hbm_to_vmem [thread:$0]  (!%p2919_p11), %s3367_s4, 48, %s219_s29, [#allocation10]  }
  0x30   : > { %s32_s28 = sadd.s32 1, %s2815_s22  ;;  %s2951_s8 = sand.u32 1, %s2807_s20  }
  0x31   : > { %p33_p3 = scmp.ge.s32.totalorder %s32_s28, 4  ;;  %s2232_s9 = smul.u32 528, %s2951_s8 }
  0x32   : > { %s2174_s10 = sshll.u32 %s2815_s22, 8  ;;  %s3369_s1 = sld [smem:[#allocation21_spill]] }
  0x33   : > { %s3393_s28 = smov (%p33_p3, %s32_s28), 0  ;;  %s233_s14 = scalar_lea.vmem [#allocation6], %s2232_s9 }
  0x34   : > { %3368 = sst [smem:[#allocation19_spill]] %s3393_s28  ;;  %s65_s29 = ssub.s32 %s2815_s22, %s3393_s28 }
  0x35   : > { %s240_s15 = sshll.u32 %s233_s14, 4  ;;  %p66_p6 = scmp.eq.s32.totalorder %s65_s29, 0  ;;  %s2964_s15 = int_to_ptr.vmem [resolvable:$true] %s240_s15 }
  0x36   : > { %s2973_s17 = scalar_lea.sflag [#allocation7], %s3354_s30  ;;  %p3371_p12 = scmp.ne.s32.totalorder %s3366_s7, 0 }
  0x37   : > { %s2969_s16 = scalar_select %p66_p6, %s2807_s20, %s68_s25  }
  0x38   : > { %s2960_s13 = scalar_lea.hbm %s3369_s1, %s2174_s10  ;;  %p2979_p13 = pneg %p3371_p12 }
  0x39   : > { %3370 = sst [smem:[#allocation20_spill]] %s2969_s16  ;;  %s2609_s18 = scalar_lea.hbm %s2960_s13, 8448 }
  0x3a   : > { %p2610_p8 = scmp.ne.s32.totalorder %s2960_s13, %s2609_s18  ;;  %s2614_s12 = scalar_lea.hbm %s3369_s1, 33792 }
  0x3b   : > { %s3372_s10 = scalar_select %p2979_p13, 1, 0 }
  0x3c   : > { %p2612_p1 = pnand %p2979_p13, %p2610_p8  ;;  %p2615_p4 = scmp.lt.u32.totalorder %s2960_s13, %s3369_s1 }
  0x3d   : > { %p2616_p5 = scmp.lt.u32.totalorder %s2614_s12, %s2609_s18  ;;  %p2618_p9 = scmp.lt.u32.totalorder %s2609_s18, %s2960_s13 }
  0x3e   : > { %p2613_p2 = pneg %p2612_p1 }
  0x3f   : > { %p2617_p7 = por %p2616_p5, %p2615_p4 }
  0x41   : > { %p2619_p10 = por %p2618_p9, %p2617_p7 }
  0x43   : > { %p2620_p3 = pnand %p2619_p10, %p2613_p2 }
  0x45   : > { %2623 = shalt.err (!%p2620_p3)
}
  0x46   : > { %s2624_s14 = scalar_lea.vmem %s2964_s15, 8448  ;;  %s2822_s9 = smov [#allocation6]  }
  0x47   : > { %p2625_p6 = scmp.ne.s32.totalorder %s2964_s15, %s2624_s14  ;;  %s2629_s11 = sshll.u32 %s2822_s9, 4  ;;  %s2630_s11 = int_to_ptr.vmem [resolvable:$false] %s2629_s11 }
  0x48   : > { %s2631_s25 = scalar_lea.vmem %s2630_s11, 16896  ;;  %p2632_p0 = scmp.lt.s32.totalorder %s2964_s15, %s2630_s11 }
  0x49   : > { %p2627_p8 = pnand %p2625_p6, %p2979_p13  ;;  %p2633_p11 = scmp.lt.s32.totalorder %s2631_s25, %s2624_s14 }
  0x4b   : > { %p2628_p1 = pneg %p2627_p8  ;;  %p2634_p4 = por %p2633_p11, %p2632_p0 }
  0x4d   : > { %p2635_p5 = pnand %p2634_p4, %p2628_p1 }
  0x4f   : > { %2638 = shalt.err (!%p2635_p5)
}
  0x50   : > { %s2823_s18 = smov 1024   ;;  %s2824_s12 = smov 256  }
  0x51   : > { %s2825_s29 = smov 16   ;;  %s2826_s30 = smov [#allocation3]  }
  0x52   : > { %2265 = dma.hbm_to_vmem [thread:$0]  (!%p3371_p12), %s2960_s13, 8448, %s2964_s15, %s2973_s17, %s2823_s18, %s2824_s12, %s2825_s29  }
  0x53   : > { %s207_s9 = sshll.u32 %s2826_s30, 4  ;;  %s1988_s1 = sshll.u32 %s2951_s8, 2  ;;  %s208_s9 = int_to_ptr.vmem [resolvable:$true] %s207_s9 }
  0x54   : > { %s2639_s25 = scalar_lea.hbm %s3341_s0, 384  ;;  %p3373_p0 = scmp.ne.s32.totalorder %s3365_s6, 0 }
  0x55   : > { %p2640_p11 = scmp.ne.s32.totalorder %s3341_s0, %s2639_s25  ;;  %p2646_p10 = scmp.lt.u32.totalorder %s2639_s25, %s3341_s0 }
  0x56   : > { %p3374_p2 = pneg %p3373_p0 }
  0x58   : > { %p2642_p7 = pnand %p2640_p11, %p3374_p2 }
  0x5a   : > { %p2643_p9 = pneg %p2642_p7 }
  0x5c   : > { %p2648_p3 = pnand %p2646_p10, %p2643_p9 }
  0x5e   : > { %2651 = shalt.err (!%p2648_p3)
}
  0x5f   : > { %s2652_s30 = scalar_lea.vmem %s208_s9, 384  ;;  %p3375_p8 = pmov %p3374_p2 }
  0x60   : > { %p2653_p6 = scmp.ne.s32.totalorder %s208_s9, %s2652_s30  ;;  %p2660_p5 = scmp.lt.s32.totalorder %s208_s9, %s208_s9 }
  0x61   : > { %p2661_p12 = scmp.lt.s32.totalorder %s2652_s30, %s2652_s30 }
  0x62   : > { %p2655_p1 = pnand %p2653_p6, %p3375_p8 }
  0x63   : > { %p2662_p13 = por %p2661_p12, %p2660_p5 }
  0x64   : > { %p2656_p4 = pneg %p2655_p1 }
  0x66   : > { %p2663_p2 = pnand %p2662_p13, %p2656_p4 }
  0x68   : > { %2666 = shalt.err (!%p2663_p2)
}
  0x69   : > { %2258 = dma.hbm_to_vmem [thread:$0]  (!%p3373_p0), %s3341_s0, 384, %s208_s9, [#allocation4]  }
  0x6a   : > { %s2175_s20 = sshll.u32 %s2815_s22, 6  ;;  %s254_s18 = scalar_lea.vmem [#allocation8], %s1988_s1 }
  0x6b   : > { %s3028_s16 = scalar_lea.hbm %s3343_s2, %s2175_s20  ;;  %s262_s12 = sshll.u32 %s254_s18, 4  ;;  %s263_s12 = int_to_ptr.vmem [resolvable:$true] %s262_s12 }
  0x6c   : > { %s2667_s6 = scalar_lea.hbm %s3028_s16, 64  ;;  %p3376_p13 = scmp.ne.s32.totalorder %s3372_s10, 0 }
  0x6d   : > { %p2668_p12 = scmp.ne.s32.totalorder %s3028_s16, %s2667_s6  ;;  %s2672_s11 = scalar_lea.hbm %s3343_s2, 256 }
  0x6e   : > { %p2673_p0 = scmp.lt.u32.totalorder %s3028_s16, %s3343_s2  ;;  %p2674_p9 = scmp.lt.u32.totalorder %s2672_s11, %s2667_s6 }
  0x6f   : > { %p2670_p11 = pnand %p2668_p12, %p3376_p13  ;;  %p2676_p3 = scmp.lt.u32.totalorder %s2667_s6, %s3028_s16 }
  0x70   : > { %p2675_p10 = por %p2674_p9, %p2673_p0 }
  0x71   : > { %p2671_p7 = pneg %p2670_p11 }
  0x72   : > { %p2677_p6 = por %p2676_p3, %p2675_p10 }
  0x74   : > { %p2678_p8 = pnand %p2677_p6, %p2671_p7 }
  0x76   : > { %2681 = shalt.err (!%p2678_p8)
}
  0x77   : > { %s2682_s1 = scalar_lea.vmem %s263_s12, 64  ;;  %s2827_s30 = smov [#allocation8]  }
  0x78   : > { %p2683_p1 = scmp.ne.s32.totalorder %s263_s12, %s2682_s1  ;;  %s2687_s4 = sshll.u32 %s2827_s30, 4  ;;  %s2688_s4 = int_to_ptr.vmem [resolvable:$false] %s2687_s4 }
  0x79   : > { %s2689_s28 = scalar_lea.vmem %s2688_s4, 128  ;;  %p2690_p2 = scmp.lt.s32.totalorder %s263_s12, %s2688_s4 }
  0x7a   : > { %p2685_p4 = pnand %p2683_p1, %p3376_p13  ;;  %p2691_p12 = scmp.lt.s32.totalorder %s2689_s28, %s2682_s1 }
  0x7c   : > { %p2686_p5 = pneg %p2685_p4  ;;  %p2692_p11 = por %p2691_p12, %p2690_p2 }
  0x7e   : > { %p2693_p0 = pnand %p2692_p11, %p2686_p5 }
  0x80   : > { %2696 = shalt.err (!%p2693_p0)
}
  0x81   : > { %p3377_p9 = scmp.ne.s32.totalorder %s3366_s7, 0  ;;  %s2233_s20 = smul.u32 768, %s2951_s8 }
  0x82   : > { %s2234_s13 = smul.u32 12288, %s2815_s22  ;;  %s3378_s11 = sand.u32 1, %s2819_s23  }
  0x83   : > { %2268 = dma.hbm_to_vmem [thread:$0]  (!%p3377_p9), %s3028_s16, 64, %s263_s12, %s2973_s17  }
  0x84   : > { %s3053_s6 = scalar_lea.hbm %s3344_s3, %s2234_s13  ;;  %s273_s29 = scalar_lea.vmem [#allocation9], %s2233_s20 }
  0x85   : > { %s281_s9 = sshll.u32 %s273_s29, 4  ;;  %s3059_s14 = scalar_lea.sflag [#allocation10], %s3378_s11  ;;  %s3055_s9 = int_to_ptr.vmem [resolvable:$true] %s281_s9 }
  0x86   : > { %s2697_s25 = scalar_lea.hbm %s3053_s6, 12288  ;;  %s2702_s16 = scalar_lea.hbm %s3344_s3, 49152 }
  0x87   : > { %p2698_p7 = scmp.ne.s32.totalorder %s3053_s6, %s2697_s25  ;;  %p2703_p6 = scmp.lt.u32.totalorder %s3053_s6, %s3344_s3 }
  0x88   : > { %p2704_p8 = scmp.lt.u32.totalorder %s2702_s16, %s2697_s25  ;;  %p2706_p4 = scmp.lt.u32.totalorder %s2697_s25, %s3053_s6 }
  0x89   : > { %p2700_p10 = pnand %p2698_p7, %p3376_p13 }
  0x8a   : > { %p2705_p1 = por %p2704_p8, %p2703_p6 }
  0x8b   : > { %p2701_p3 = pneg %p2700_p10 }
  0x8c   : > { %p2707_p5 = por %p2706_p4, %p2705_p1 }
  0x8e   : > { %p2708_p2 = pnand %p2707_p5, %p2701_p3 }
  0x90   : > { %2711 = shalt.err (!%p2708_p2)
}
  0x91   : > { %s2712_s30 = scalar_lea.vmem %s3055_s9, 12288  ;;  %s2828_s4 = smov [#allocation9]  }
  0x92   : > { %p2713_p12 = scmp.ne.s32.totalorder %s3055_s9, %s2712_s30  ;;  %s2717_s28 = sshll.u32 %s2828_s4, 4  ;;  %s2718_s28 = int_to_ptr.vmem [resolvable:$false] %s2717_s28 }
  0x93   : > { %s2719_s20 = scalar_lea.vmem %s2718_s28, 24576  ;;  %p2720_p7 = scmp.lt.s32.totalorder %s3055_s9, %s2718_s28 }
  0x94   : > { %p2715_p11 = pnand %p2713_p12, %p3376_p13  ;;  %p2721_p10 = scmp.lt.s32.totalorder %s2719_s20, %s2712_s30 }
  0x96   : > { %p2716_p0 = pneg %p2715_p11  ;;  %p2722_p6 = por %p2721_p10, %p2720_p7 }
  0x98   : > { %p2723_p8 = pnand %p2722_p6, %p2716_p0 }
  0x9a   : > { %2726 = shalt.err (!%p2723_p8)
}
  0x9b   : > { %s2829_s13 = smov 192   ;;  %s2830_s15 = smov 12  }
  0x9c   : > { %2271 = dma.hbm_to_vmem [thread:$0]  (!%p3377_p9), %s3053_s6, 12288, %s3055_s9, %s3059_s14, %s2829_s13, %s2829_s13, %s2830_s15  }
  0x9d   : > { %p3379_p13 = scmp.ne.s32.totalorder %s3364_s27, 0 }
  0x9e   : > { %p3380_p3 = scmp.eq.s32.totalorder (!%p3379_p13), %s2893_s24, 0 }
  0x9f   : > { %293 = sbr.rel (%p3379_p13) target bundleno = 798 (0x31e), region = 40 }
  0xa6   : > { %2778 = dma.done.wait (%p3380_p3), [#allocation4], 384   ;;  %p3381_p1 = pmov %p3380_p3 }
  0xa7   : > { %s299_s10 = sand.u32 1, %s2893_s24   ;;  %s301_s18 = sand.u32 1, %s2803_s19  }
  0xa8   : > { %2780 = vsyncadd (%p3381_p1), [#allocation4], 4294966912  ;;  %s2235_s29 = smul.u32 528, %s301_s18  ;;  %s300_s11 = scalar_lea.sflag [#allocation7], %s299_s10 }
  0xa9   : > { %p3382_p4 = scmp.ne.s32.totalorder %s3363_s26, 0 }
  0xaa   : > { %s3091_s25 = scalar_lea.vmem [#allocation6], %s2235_s29 }
  0xab   : > { %2782 = dma.done.wait (%p3382_p4), %s300_s11, 8512  }
  0xac   : > { %2784 = vsyncadd (%p3382_p4), %s300_s11, 4294958784  ;;  %s1996_s27 = sshll.u32 %s301_s18, 2  ;;  %s2236_s7 = smul.u32 768, %s301_s18 }
  0xad   : > { %s3097_s6 = scalar_lea.vmem [#allocation8], %s1996_s27  ;;  %s318_s9 = scalar_lea.sflag [#allocation10], %s299_s10 }
  0xae   : > { %s3099_s14 = scalar_lea.vmem [#allocation9], %s2236_s7 }
  0xaf   : > { %2786 = dma.done.wait (%p3382_p4), %s318_s9, 12288  }
  0xb0   : > { %2788 = vsyncadd (%p3382_p4), %s318_s9, 4294955008  ;;  %p3383_p9 = pmov %p3381_p1 }
  0xb1   : > { %p3384_p5 = pmov %p3381_p1 }
  0xb2   : > { %2790 = dma.done.wait (%p3383_p9), [#allocation10], 48  }
  0xb3   : > { %2792 = vsyncadd (%p3384_p5), [#allocation10], 4294967248  ;;  %p1998_p2 = scmp.ne.s32.totalorder %s2811_s21, 0 }
  0xb4   : > { %v2831_v0 = vmov (!%p1998_p2), 0.0  }
  0xb5   : > { %364 = sbr.rel (%p1998_p2) target bundleno = 188 (0xbc), region = 64  ;;  %365 = vst [vmem:[#allocation2] sm:$0xff] (!%p1998_p2), %v2831_v0  ;;  %366 = vst [vmem:[#allocation2 + $0x8] sm:$0xff] (!%p1998_p2), %v2831_v0 }
  0xb6   : > { %367 = vst [vmem:[#allocation2 + $0x10] sm:$0xff] (!%p1998_p2), %v2831_v0 }
  0xbc PF: > { %v2337_v1 = vld [vmem:[%s3091_s25 + $0x4] ss:$16 sps:$4 sm:$0xff]   ;;  %v2339_v2 = vld [vmem:[%s3091_s25 + $0xc] ss:$16 sps:$4 sm:$0xff]   ;;  %v2341_v3 = vld [vmem:[%s3091_s25] ss:$16 sps:$4 sm:$0xff]  }
  0xbd   : > { %811 = vmatprep.subr.bf16.mxu0 %v2337_v1  ;;  %v2342_v4 = vld [vmem:[%s3091_s25 + $0x8] ss:$16 sps:$4 sm:$0xff]   ;;  %893 = vmatprep.subr.bf16.mxu1 %v2339_v2  ;;  %v2343_v5 = vld [vmem:[%s3091_s25 + $0x24] ss:$16 sps:$4 sm:$0xff]   ;;  %v2345_v6 = vld [vmem:[%s3091_s25 + $0x2c] ss:$16 sps:$4 sm:$0xff]  }
  0xbe   : > { %812 = vmatpush1.bf16.msra.mxu0 %v2341_v3  ;;  %894 = vmatpush1.bf16.msra.mxu1 %v2342_v4  ;;  %v2347_v7 = vld [vmem:[%s3091_s25 + $0x20] ss:$16 sps:$4 sm:$0xff]   ;;  %v2348_v8 = vld [vmem:[%s3091_s25 + $0x28] ss:$16 sps:$4 sm:$0xff]   ;;  %v2349_v9 = vld [vmem:[%s3091_s25 + $0x44] ss:$16 sps:$4 sm:$0xff]  }
  0xbf   : > { %813 = vmatprep.subr.bf16.mxu0 %v2343_v5  ;;  %895 = vmatprep.subr.bf16.mxu1 %v2345_v6  ;;  %v2351_v10 = vld [vmem:[%s3091_s25 + $0x4c] ss:$16 sps:$4 sm:$0xff]   ;;  %v2353_v11 = vld [vmem:[%s3091_s25 + $0x40] ss:$16 sps:$4 sm:$0xff]   ;;  %v2354_v12 = vld [vmem:[%s3091_s25 + $0x48] ss:$16 sps:$4 sm:$0xff]  }
  0xc0   : > { %v2355_v13 = vld [vmem:[%s3091_s25 + $0x64] ss:$16 sps:$4 sm:$0xff]   ;;  %v2357_v14 = vld [vmem:[%s3091_s25 + $0x6c] ss:$16 sps:$4 sm:$0xff]   ;;  %v2359_v15 = vld [vmem:[%s3091_s25 + $0x60] ss:$16 sps:$4 sm:$0xff]  }
  0xc1   : > { %v2360_v16 = vld [vmem:[%s3091_s25 + $0x68] ss:$16 sps:$4 sm:$0xff]   ;;  %v2361_v17 = vld [vmem:[%s3091_s25 + $0x84] ss:$16 sps:$4 sm:$0xff]   ;;  %v2363_v18 = vld [vmem:[%s3091_s25 + $0x8c] ss:$16 sps:$4 sm:$0xff]  }
  0xc2   : > { %814 = vmatpush1.bf16.msra.mxu0 %v2347_v7  ;;  %896 = vmatpush1.bf16.msra.mxu1 %v2348_v8  ;;  %v2365_v19 = vld [vmem:[%s3091_s25 + $0x80] ss:$16 sps:$4 sm:$0xff]   ;;  %v2366_v20 = vld [vmem:[%s3091_s25 + $0x88] ss:$16 sps:$4 sm:$0xff]   ;;  %v2367_v21 = vld [vmem:[%s3091_s25 + $0xa4] ss:$16 sps:$4 sm:$0xff]  }
  0xc3   : > { %815 = vmatprep.subr.bf16.mxu0 %v2349_v9  ;;  %897 = vmatprep.subr.bf16.mxu1 %v2351_v10  ;;  %v2369_v22 = vld [vmem:[%s3091_s25 + $0xac] ss:$16 sps:$4 sm:$0xff]   ;;  %v2371_v23 = vld [vmem:[%s3091_s25 + $0xa0] ss:$16 sps:$4 sm:$0xff]   ;;  %v2372_v24 = vld [vmem:[%s3091_s25 + $0xa8] ss:$16 sps:$4 sm:$0xff]  }
  0xc4   : > { %v2373_v25 = vld [vmem:[%s3091_s25 + $0xc4] ss:$16 sps:$4 sm:$0xff]   ;;  %v2375_v26 = vld [vmem:[%s3091_s25 + $0xcc] ss:$16 sps:$4 sm:$0xff]   ;;  %v2377_v27 = vld [vmem:[%s3091_s25 + $0xc0] ss:$16 sps:$4 sm:$0xff]  }
  0xc5   : > { %v2378_v28 = vld [vmem:[%s3091_s25 + $0xc8] ss:$16 sps:$4 sm:$0xff]   ;;  %v2379_v29 = vld [vmem:[%s3091_s25 + $0xe4] ss:$16 sps:$4 sm:$0xff]   ;;  %v2381_v30 = vld [vmem:[%s3091_s25 + $0xec] ss:$16 sps:$4 sm:$0xff]  }
  0xc6   : > { %816 = vmatpush1.bf16.msra.mxu0 %v2353_v11  ;;  %898 = vmatpush1.bf16.msra.mxu1 %v2354_v12  ;;  %v2383_v31 = vld [vmem:[%s3091_s25 + $0xe0] ss:$16 sps:$4 sm:$0xff]   ;;  %v2384_v32 = vld [vmem:[%s3091_s25 + $0xe8] ss:$16 sps:$4 sm:$0xff]   ;;  %v2385_v33 = vld [vmem:[%s3091_s25 + $0x104] ss:$16 sps:$4 sm:$0xff]  }
  0xc7   : > { %817 = vmatprep.subr.bf16.mxu0 %v2355_v13  ;;  %899 = vmatprep.subr.bf16.mxu1 %v2357_v14  ;;  %v2387_v34 = vld [vmem:[%s3091_s25 + $0x10c] ss:$16 sps:$4 sm:$0xff]   ;;  %v2389_v35 = vld [vmem:[%s3091_s25 + $0x100] ss:$16 sps:$4 sm:$0xff]   ;;  %v2390_v36 = vld [vmem:[%s3091_s25 + $0x108] ss:$16 sps:$4 sm:$0xff]  }
  0xc8   : > { %v2391_v37 = vld [vmem:[%s3091_s25 + $0x124] ss:$16 sps:$4 sm:$0xff]   ;;  %v2393_v38 = vld [vmem:[%s3091_s25 + $0x12c] ss:$16 sps:$4 sm:$0xff]   ;;  %v2395_v39 = vld [vmem:[%s3091_s25 + $0x120] ss:$16 sps:$4 sm:$0xff]  }
  0xc9   : > { %v2396_v40 = vld [vmem:[%s3091_s25 + $0x128] ss:$16 sps:$4 sm:$0xff]   ;;  %v2397_v41 = vld [vmem:[%s3091_s25 + $0x144] ss:$16 sps:$4 sm:$0xff]   ;;  %v2399_v42 = vld [vmem:[%s3091_s25 + $0x14c] ss:$16 sps:$4 sm:$0xff]  }
  0xca   : > { %818 = vmatpush1.bf16.msra.mxu0 %v2359_v15  ;;  %900 = vmatpush1.bf16.msra.mxu1 %v2360_v16  ;;  %v2401_v43 = vld [vmem:[%s3091_s25 + $0x140] ss:$16 sps:$4 sm:$0xff]   ;;  %v2402_v44 = vld [vmem:[%s3091_s25 + $0x148] ss:$16 sps:$4 sm:$0xff]   ;;  %v2403_v45 = vld [vmem:[%s3091_s25 + $0x164] ss:$16 sps:$4 sm:$0xff]  }
  0xcb   : > { %819 = vmatprep.subr.bf16.mxu0 %v2361_v17  ;;  %901 = vmatprep.subr.bf16.mxu1 %v2363_v18  ;;  %v2405_v46 = vld [vmem:[%s3091_s25 + $0x16c] ss:$16 sps:$4 sm:$0xff]   ;;  %v369_v47 = vld [vmem:[#allocation3 + $0x8] sm:$0xff]  ;;  %v2408_v50 = vld [vmem:[%s3091_s25 + $0x168] ss:$16 sps:$4 sm:$0xff]   ;;  %vm796_vm0 = vcmask 1040384  }
  0xcc   : > { %v2407_v48 = vld [vmem:[%s3091_s25 + $0x160] ss:$16 sps:$4 sm:$0xff]   ;;  %v372_v49 = vpack.c.bf16 %v369_v47, %v369_v47  ;;  %v2409_v51 = vld [vmem:[%s3091_s25 + $0x184] ss:$16 sps:$4 sm:$0xff]   ;;  %v2411_v52 = vld [vmem:[%s3091_s25 + $0x18c] ss:$16 sps:$4 sm:$0xff]  }
  0xcd   : > { %v2413_v53 = vld [vmem:[%s3091_s25 + $0x180] ss:$16 sps:$4 sm:$0xff]   ;;  %v2414_v54 = vld [vmem:[%s3091_s25 + $0x188] ss:$16 sps:$4 sm:$0xff]   ;;  %v2415_v55 = vld [vmem:[%s3091_s25 + $0x1a4] ss:$16 sps:$4 sm:$0xff]  }
  0xce   : > { %820 = vmatpush1.bf16.msra.mxu0 %v2365_v19  ;;  %902 = vmatpush1.bf16.msra.mxu1 %v2366_v20  ;;  %v2417_v56 = vld [vmem:[%s3091_s25 + $0x1ac] ss:$16 sps:$4 sm:$0xff]   ;;  %v2419_v57 = vld [vmem:[%s3091_s25 + $0x1a0] ss:$16 sps:$4 sm:$0xff]   ;;  %v2420_v58 = vld [vmem:[%s3091_s25 + $0x1a8] ss:$16 sps:$4 sm:$0xff]  }
  0xcf   : > { %821 = vmatprep.subr.bf16.mxu0 %v2367_v21  ;;  %903 = vmatprep.subr.bf16.mxu1 %v2369_v22  ;;  %v2421_v59 = vld [vmem:[%s3091_s25 + $0x1c4] ss:$16 sps:$4 sm:$0xff]   ;;  %v2423_v60 = vld [vmem:[%s3091_s25 + $0x1cc] ss:$16 sps:$4 sm:$0xff]   ;;  %v2425_v63 = vld [vmem:[%s3091_s25 + $0x1c0] ss:$16 sps:$4 sm:$0xff]  }
  0xd0   : > { %843 = vmatprep.mubr.bf16.mxu0 %v372_v49  ;;  %925 = vmatprep.mubr.bf16.mxu1 %v372_v49  ;;  %v438_v61 = vld [vmem:[%s3091_s25 + $0x200] sm:$0x11]  ;;  %v439_v62 = vld [vmem:[%s3091_s25 + $0x208] sm:$0x11]  ;;  %v2832_v6 = vmov 0   ;;  %vm792_vm1 = vcmask 7168  }
  0xd1   : > { %v2426_v0 = vld [vmem:[%s3091_s25 + $0x1c8] ss:$16 sps:$4 sm:$0xff]   ;;  %v2427_v1 = vld [vmem:[%s3091_s25 + $0x1e4] ss:$16 sps:$4 sm:$0xff]   ;;  %v2429_v2 = vld [vmem:[%s3091_s25 + $0x1ec] ss:$16 sps:$4 sm:$0xff]   ;;  %v2064_v3 = vcombine.high %v438_v61, %v438_v61  ;;  %v2066_v4 = vcombine.high %v439_v62, %v439_v62  ;;  %v2063_v10 = vcombine.low %v438_v61, %v438_v61  ;;  %v2065_v11 = vcombine.low %v439_v62, %v439_v62 }
  0xd2   : > { %822 = vmatpush1.bf16.msra.mxu0 %v2371_v23  ;;  %904 = vmatpush1.bf16.msra.mxu1 %v2372_v24  ;;  %v2431_v5 = vld [vmem:[%s3091_s25 + $0x1e0] ss:$16 sps:$4 sm:$0xff]   ;;  %v798_v7 = vsel %vm796_vm0, 65535, %v2832_v6  ;;  %v2432_v8 = vld [vmem:[%s3091_s25 + $0x1e8] ss:$16 sps:$4 sm:$0xff]   ;;  %p2169_p12 = scmp.ne.s32.totalorder %s2811_s21, 3 }
  0xd3   : > { %823 = vmatprep.subr.bf16.mxu0 %v2373_v25  ;;  %905 = vmatprep.subr.bf16.mxu1 %v2375_v26  ;;  %v368_v9 = vld [vmem:[#allocation3] sm:$0xff]  ;;  %v803_v12 = vand.u32 %v2064_v3, %v798_v7  ;;  %v809_v13 = vand.u32 %v2066_v4, %v798_v7  ;;  %v800_v15 = vand.u32 %v2063_v10, %v798_v7  ;;  %v370_v19 = vld [vmem:[#allocation3 + $0x10] sm:$0xff]  ;;  %v2445_v23 = vld [vmem:[%s3099_s14 + $0x1c] ss:$12 sps:$4 sm:$0xff]  }
  0xd4   : > { %v371_v14 = vpack.c.bf16 %v368_v9, %v368_v9  ;;  %v806_v16 = vand.u32 %v2065_v11, %v798_v7  ;;  %v2439_v17 = vld [vmem:[%s3099_s14 + $0x4] ss:$12 sps:$4 sm:$0xff]   ;;  %v2437_v20 = vld [vmem:[%s3099_s14] ss:$12 sps:$4 sm:$0xff]   ;;  %v373_v22 = vpack.c.bf16 %v370_v19, %v370_v19  ;;  %v2448_v24 = vld [vmem:[%s3099_s14 + $0x19c] ss:$12 sps:$4 sm:$0xff]  }
  0xd5   : > { %v2442_v18 = vld [vmem:[%s3099_s14 + $0x184] ss:$12 sps:$4 sm:$0xff]   ;;  %v2440_v21 = vld [vmem:[%s3099_s14 + $0x180] ss:$12 sps:$4 sm:$0xff]   ;;  %v2479_v49 = vld [vmem:[%s3099_s14 + $0xa8] ss:$12 sps:$4 sm:$0xff]  }
  0xd6   : > { %824 = vmatpush1.bf16.msra.mxu0 %v2377_v27  ;;  %906 = vmatpush1.bf16.msra.mxu1 %v2378_v28  ;;  %v2443_v25 = vld [vmem:[%s3099_s14 + $0x18] ss:$12 sps:$4 sm:$0xff]   ;;  %v2451_v27 = vld [vmem:[%s3099_s14 + $0x34] ss:$12 sps:$4 sm:$0xff]   ;;  %v2497_v61 = vld [vmem:[%s3099_s14 + $0xf0] ss:$12 sps:$4 sm:$0xff]  }
  0xd7   : > { %825 = vmatprep.subr.bf16.mxu0 %v2379_v29  ;;  %907 = vmatprep.subr.bf16.mxu1 %v2381_v30  ;;  %v2446_v26 = vld [vmem:[%s3099_s14 + $0x198] ss:$12 sps:$4 sm:$0xff]   ;;  %v2454_v28 = vld [vmem:[%s3099_s14 + $0x1b4] ss:$12 sps:$4 sm:$0xff]   ;;  %v2449_v29 = vld [vmem:[%s3099_s14 + $0x30] ss:$12 sps:$4 sm:$0xff]  }
  0xd8   : > { %v2452_v30 = vld [vmem:[%s3099_s14 + $0x1b0] ss:$12 sps:$4 sm:$0xff]   ;;  %v2481_v47 = vld [vmem:[%s3099_s14 + $0xac] ss:$12 sps:$4 sm:$0xff]   ;;  %v2523_v11 = vld [vmem:[%s3099_s14 + $0x154] ss:$12 sps:$4 sm:$0xff]  }
  0xd9   : > { %v2500_v62 = vld [vmem:[%s3099_s14 + $0x270] ss:$12 sps:$4 sm:$0xff]   ;;  %v2515_v9 = vld [vmem:[%s3099_s14 + $0x138] ss:$12 sps:$4 sm:$0xff]   ;;  %v2533_v19 = vld [vmem:[%s3099_s14 + $0xc8] ss:$12 sps:$4 sm:$0xff]  }
  0xda   : > { %826 = vmatpush1.bf16.msra.mxu0 %v2383_v31  ;;  %908 = vmatpush1.bf16.msra.mxu1 %v2384_v32  ;;  %v2457_v31 = vld [vmem:[%s3099_s14 + $0x4c] ss:$12 sps:$4 sm:$0xff]   ;;  %v2511_v3 = vld [vmem:[%s3099_s14 + $0x124] ss:$12 sps:$4 sm:$0xff]   ;;  %v2517_v7 = vld [vmem:[%s3099_s14 + $0x13c] ss:$12 sps:$4 sm:$0xff]  }
  0xdb   : > { %827 = vmatprep.subr.bf16.mxu0 %v2385_v33  ;;  %909 = vmatprep.subr.bf16.mxu1 %v2387_v34  ;;  %v2460_v32 = vld [vmem:[%s3099_s14 + $0x1cc] ss:$12 sps:$4 sm:$0xff]   ;;  %v2455_v33 = vld [vmem:[%s3099_s14 + $0x48] ss:$12 sps:$4 sm:$0xff]   ;;  %v2514_v4 = vld [vmem:[%s3099_s14 + $0x2a4] ss:$12 sps:$4 sm:$0xff]  }
  0xdc   : > { %v2458_v34 = vld [vmem:[%s3099_s14 + $0x1c8] ss:$12 sps:$4 sm:$0xff]   ;;  %v2518_v10 = vld [vmem:[%s3099_s14 + $0x2b8] ss:$12 sps:$4 sm:$0xff]  }
  0xde   : > { %828 = vmatpush1.bf16.msra.mxu0 %v2389_v35  ;;  %910 = vmatpush1.bf16.msra.mxu1 %v2390_v36  ;;  %v2463_v35 = vld [vmem:[%s3099_s14 + $0x64] ss:$12 sps:$4 sm:$0xff]  }
  0xdf   : > { %829 = vmatprep.subr.bf16.mxu0 %v2391_v37  ;;  %911 = vmatprep.subr.bf16.mxu1 %v2393_v38  ;;  %v2466_v36 = vld [vmem:[%s3099_s14 + $0x1e4] ss:$12 sps:$4 sm:$0xff]   ;;  %v2461_v37 = vld [vmem:[%s3099_s14 + $0x60] ss:$12 sps:$4 sm:$0xff]  }
  0xe0   : > { %v2464_v38 = vld [vmem:[%s3099_s14 + $0x1e0] ss:$12 sps:$4 sm:$0xff]  }
  0xe2   : > { %830 = vmatpush1.bf16.msra.mxu0 %v2395_v39  ;;  %912 = vmatpush1.bf16.msra.mxu1 %v2396_v40  ;;  %v2469_v39 = vld [vmem:[%s3099_s14 + $0x7c] ss:$12 sps:$4 sm:$0xff]  }
  0xe3   : > { %831 = vmatprep.subr.bf16.mxu0 %v2397_v41  ;;  %913 = vmatprep.subr.bf16.mxu1 %v2399_v42  ;;  %v2472_v40 = vld [vmem:[%s3099_s14 + $0x1fc] ss:$12 sps:$4 sm:$0xff]   ;;  %v2467_v41 = vld [vmem:[%s3099_s14 + $0x78] ss:$12 sps:$4 sm:$0xff]  }
  0xe4   : > { %v2470_v42 = vld [vmem:[%s3099_s14 + $0x1f8] ss:$12 sps:$4 sm:$0xff]  }
  0xe6   : > { %832 = vmatpush1.bf16.msra.mxu0 %v2401_v43  ;;  %914 = vmatpush1.bf16.msra.mxu1 %v2402_v44  ;;  %v2475_v43 = vld [vmem:[%s3099_s14 + $0x94] ss:$12 sps:$4 sm:$0xff]  }
  0xe7   : > { %833 = vmatprep.subr.bf16.mxu0 %v2403_v45  ;;  %915 = vmatprep.subr.bf16.mxu1 %v2405_v46  ;;  %v2478_v44 = vld [vmem:[%s3099_s14 + $0x214] ss:$12 sps:$4 sm:$0xff]   ;;  %v2473_v45 = vld [vmem:[%s3099_s14 + $0x90] ss:$12 sps:$4 sm:$0xff]  }
  0xe8   : > { %v2476_v46 = vld [vmem:[%s3099_s14 + $0x210] ss:$12 sps:$4 sm:$0xff]  }
  0xea   : > { %834 = vmatpush1.bf16.msra.mxu0 %v2407_v48  ;;  %916 = vmatpush1.bf16.msra.mxu1 %v2408_v50  ;;  %v2484_v48 = vld [vmem:[%s3099_s14 + $0x22c] ss:$12 sps:$4 sm:$0xff]   ;;  %v2482_v50 = vld [vmem:[%s3099_s14 + $0x228] ss:$12 sps:$4 sm:$0xff]  }
  0xeb   : > { %835 = vmatprep.subr.bf16.mxu0 %v2409_v51  ;;  %917 = vmatprep.subr.bf16.mxu1 %v2411_v52  ;;  %v2487_v51 = vld [vmem:[%s3099_s14 + $0xc4] ss:$12 sps:$4 sm:$0xff]  }
  0xec   : > { %v2490_v52 = vld [vmem:[%s3099_s14 + $0x244] ss:$12 sps:$4 sm:$0xff]  }
  0xee   : > { %836 = vmatpush1.bf16.msra.mxu0 %v2413_v53  ;;  %918 = vmatpush1.bf16.msra.mxu1 %v2414_v54  ;;  %v2485_v53 = vld [vmem:[%s3099_s14 + $0xc0] ss:$12 sps:$4 sm:$0xff]  }
  0xef   : > { %837 = vmatprep.subr.bf16.mxu0 %v2415_v55  ;;  %919 = vmatprep.subr.bf16.mxu1 %v2417_v56  ;;  %v2488_v54 = vld [vmem:[%s3099_s14 + $0x240] ss:$12 sps:$4 sm:$0xff]   ;;  %v2493_v55 = vld [vmem:[%s3099_s14 + $0xdc] ss:$12 sps:$4 sm:$0xff]  }
  0xf0   : > { %v2496_v56 = vld [vmem:[%s3099_s14 + $0x25c] ss:$12 sps:$4 sm:$0xff]  }
  0xf2   : > { %838 = vmatpush1.bf16.msra.mxu0 %v2419_v57  ;;  %920 = vmatpush1.bf16.msra.mxu1 %v2420_v58  ;;  %v2491_v57 = vld [vmem:[%s3099_s14 + $0xd8] ss:$12 sps:$4 sm:$0xff]  }
  0xf3   : > { %839 = vmatprep.subr.bf16.mxu0 %v2421_v59  ;;  %921 = vmatprep.subr.bf16.mxu1 %v2423_v60  ;;  %v2494_v58 = vld [vmem:[%s3099_s14 + $0x258] ss:$12 sps:$4 sm:$0xff]   ;;  %v2499_v59 = vld [vmem:[%s3099_s14 + $0xf4] ss:$12 sps:$4 sm:$0xff]  }
  0xf4   : > { %v2502_v60 = vld [vmem:[%s3099_s14 + $0x274] ss:$12 sps:$4 sm:$0xff]  }
  0xf6   : > { %840 = vmatpush1.bf16.msra.mxu0 %v2425_v63  ;;  %922 = vmatpush1.bf16.msra.mxu1 %v2426_v0  ;;  %v2505_v63 = vld [vmem:[%s3099_s14 + $0x10c] ss:$12 sps:$4 sm:$0xff]  }
  0xf7   : > { %841 = vmatprep.subr.bf16.mxu0 %v2427_v1  ;;  %923 = vmatprep.subr.bf16.mxu1 %v2429_v2  ;;  %v2508_v0 = vld [vmem:[%s3099_s14 + $0x28c] ss:$12 sps:$4 sm:$0xff]   ;;  %v2503_v1 = vld [vmem:[%s3099_s14 + $0x108] ss:$12 sps:$4 sm:$0xff]  }
  0xf8   : > { %v2506_v2 = vld [vmem:[%s3099_s14 + $0x288] ss:$12 sps:$4 sm:$0xff]  }
  0xfa   : > { %842 = vmatpush1.bf16.msra.mxu0 %v2431_v5  ;;  %924 = vmatpush1.bf16.msra.mxu1 %v2432_v8  ;;  %v2509_v5 = vld [vmem:[%s3099_s14 + $0x120] ss:$12 sps:$4 sm:$0xff]   ;;  %v2520_v8 = vld [vmem:[%s3099_s14 + $0x2bc] ss:$12 sps:$4 sm:$0xff]  }
  0xfb   : > { %852 = vmatprep.subr.bf16.mxu0 %v803_v12  ;;  %934 = vmatprep.subr.bf16.mxu1 %v809_v13  ;;  %v2526_v12 = vld [vmem:[%s3099_s14 + $0x2d4] ss:$12 sps:$4 sm:$0xff]   ;;  %v2521_v13 = vld [vmem:[%s3099_s14 + $0x150] ss:$12 sps:$4 sm:$0xff]  }
  0xfd   : > { %844 = vmatmul.mubr.bf16.vlgmr.msra.gmra.mrb[0].mxu0 %v371_v14  ;;  %926 = vmatmul.mubr.bf16.vlgmr.msra.gmra.mrb[0].mxu1 %v371_v14  ;;  %v2524_v14 = vld [vmem:[%s3099_s14 + $0x2d0] ss:$12 sps:$4 sm:$0xff]  }
  0xfe   : > { %853 = vmatpush1.bf16.msra.mxu0 %v800_v15  ;;  %935 = vmatpush1.bf16.msra.mxu1 %v806_v16  ;;  %v2529_v15 = vld [vmem:[%s3099_s14 + $0x16c] ss:$12 sps:$4 sm:$0xff]  }
  0xff   : > { %884 = vmatprep.mubr.bf16.mxu0 %v2832_v6  ;;  %966 = vmatprep.mubr.bf16.mxu1 %v2832_v6  ;;  %v2512_v6 = vld [vmem:[%s3099_s14 + $0x2a0] ss:$12 sps:$4 sm:$0xff]  }
 0x100   : > { %1646 = vmatprep.subr.bf16.mxu0 %v2439_v17  ;;  %1687 = vmatprep.subr.bf16.mxu1 %v2442_v18  ;;  %v2532_v16 = vld [vmem:[%s3099_s14 + $0x2ec] ss:$12 sps:$4 sm:$0xff]   ;;  %v2527_v17 = vld [vmem:[%s3099_s14 + $0x168] ss:$12 sps:$4 sm:$0xff]  }
 0x101   : > { %v2530_v18 = vld [vmem:[%s3099_s14 + $0x2e8] ss:$12 sps:$4 sm:$0xff]  }
 0x109   : > { %2067 = vmatmul.mubr.msk.bf16.vlgmr.msra.gmra.mrb[0].mxu0 %vm792_vm1, %v373_v22  ;;  %2068 = vmatmul.mubr.msk.bf16.vlgmr.msra.gmra.mrb[0].mxu1 %vm792_vm1, %v373_v22 }
 0x10a   : > { %1647 = vmatpush1.bf16.msra.mxu0 %v2437_v20  ;;  %1688 = vmatpush1.bf16.msra.mxu1 %v2440_v21  ;;  %v2534_v20 = vld [vmem:[%s3099_s14 + $0x248] ss:$12 sps:$4 sm:$0xff]   ;;  %v442_v21 = vlaneseq }
 0x10b   : > { %1648 = vmatprep.subr.bf16.mxu0 %v2445_v23  ;;  %1689 = vmatprep.subr.bf16.mxu1 %v2448_v24 }
 0x10c   : > { %v3242_v22 = vshrl.u32 %v442_v21, 7  ;;  %v2556_v21 = vld [vmem:[%s3099_s14 + $0x200] ss:$12 sps:$4 sm:$0xff]  }
 0x10e   : > { %1649 = vmatpush1.bf16.msra.mxu0 %v2443_v25  ;;  %1690 = vmatpush1.bf16.msra.mxu1 %v2446_v26  ;;  %v444_v23 = vsub.s32 0, %v3242_v22  ;;  %v452_v24 = vsub.s32 2, %v3242_v22  ;;  %v440_v25 = vld [vmem:[%s3097_s6] sm:$0xf]  ;;  %v448_v26 = vsub.s32 1, %v3242_v22 }
 0x10f   : > { %1650 = vmatprep.subr.bf16.mxu0 %v2451_v27  ;;  %1691 = vmatprep.subr.bf16.mxu1 %v2454_v28  ;;  %v456_v27 = vsub.s32 3, %v3242_v22 }
 0x110   : > { %v445_v28 = vrot.slane %v440_v25, %v444_v23 }
 0x112   : > { %1651 = vmatpush1.bf16.msra.mxu0 %v2449_v29  ;;  %1692 = vmatpush1.bf16.msra.mxu1 %v2452_v30  ;;  %v453_v29 = vrot.slane %v440_v25, %v452_v24  ;;  %v449_v30 = vrot.slane %v440_v25, %v448_v26 }
 0x113   : > { %1652 = vmatprep.subr.bf16.mxu0 %v2457_v31  ;;  %1693 = vmatprep.subr.bf16.mxu1 %v2460_v32  ;;  %v457_v31 = vrot.slane %v440_v25, %v456_v27  ;;  %v2557_v25 = vld [vmem:[%s3099_s14 + $0x158] ss:$12 sps:$4 sm:$0xff]  }
 0x114   : > { %v2558_v27 = vld [vmem:[%s3099_s14 + $0x2d8] ss:$12 sps:$4 sm:$0xff]  }
 0x116   : > { %1653 = vmatpush1.bf16.msra.mxu0 %v2455_v33  ;;  %1694 = vmatpush1.bf16.msra.mxu1 %v2458_v34 }
 0x117   : > { %1654 = vmatprep.subr.bf16.mxu0 %v2463_v35  ;;  %1695 = vmatprep.subr.bf16.mxu1 %v2466_v36 }
 0x11a   : > { %1655 = vmatpush1.bf16.msra.mxu0 %v2461_v37  ;;  %1696 = vmatpush1.bf16.msra.mxu1 %v2464_v38 }
 0x11b   : > { %1656 = vmatprep.subr.bf16.mxu0 %v2469_v39  ;;  %1697 = vmatprep.subr.bf16.mxu1 %v2472_v40 }
 0x11e   : > { %1657 = vmatpush1.bf16.msra.mxu0 %v2467_v41  ;;  %1698 = vmatpush1.bf16.msra.mxu1 %v2470_v42 }
 0x11f   : > { %1658 = vmatprep.subr.bf16.mxu0 %v2475_v43  ;;  %1699 = vmatprep.subr.bf16.mxu1 %v2478_v44 }
 0x122   : > { %1659 = vmatpush1.bf16.msra.mxu0 %v2473_v45  ;;  %1700 = vmatpush1.bf16.msra.mxu1 %v2476_v46 }
 0x123   : > { %1660 = vmatprep.subr.bf16.mxu0 %v2481_v47  ;;  %1701 = vmatprep.subr.bf16.mxu1 %v2484_v48 }
 0x126   : > { %1661 = vmatpush1.bf16.msra.mxu0 %v2479_v49  ;;  %1702 = vmatpush1.bf16.msra.mxu1 %v2482_v50 }
 0x127   : > { %1662 = vmatprep.subr.bf16.mxu0 %v2487_v51  ;;  %1703 = vmatprep.subr.bf16.mxu1 %v2490_v52 }
 0x12a   : > { %1663 = vmatpush1.bf16.msra.mxu0 %v2485_v53  ;;  %1704 = vmatpush1.bf16.msra.mxu1 %v2488_v54 }
 0x12b   : > { %1664 = vmatprep.subr.bf16.mxu0 %v2493_v55  ;;  %1705 = vmatprep.subr.bf16.mxu1 %v2496_v56 }
 0x12e   : > { %1665 = vmatpush1.bf16.msra.mxu0 %v2491_v57  ;;  %1706 = vmatpush1.bf16.msra.mxu1 %v2494_v58 }
 0x12f   : > { %1666 = vmatprep.subr.bf16.mxu0 %v2499_v59  ;;  %1707 = vmatprep.subr.bf16.mxu1 %v2502_v60 }
 0x132   : > { %1667 = vmatpush1.bf16.msra.mxu0 %v2497_v61  ;;  %1708 = vmatpush1.bf16.msra.mxu1 %v2500_v62  ;;  %v2535_v61 = vld [vmem:[%s3099_s14 + $0x8] ss:$12 sps:$4 sm:$0xff]  }
 0x133   : > { %1668 = vmatprep.subr.bf16.mxu0 %v2505_v63  ;;  %1709 = vmatprep.subr.bf16.mxu1 %v2508_v0  ;;  %v2536_v0 = vld [vmem:[%s3099_s14 + $0x188] ss:$12 sps:$4 sm:$0xff]  }
 0x136   : > { %1669 = vmatpush1.bf16.msra.mxu0 %v2503_v1  ;;  %1710 = vmatpush1.bf16.msra.mxu1 %v2506_v2  ;;  %v2537_v2 = vld [vmem:[%s3099_s14 + $0xe0] ss:$12 sps:$4 sm:$0xff]  }
 0x137   : > { %1670 = vmatprep.subr.bf16.mxu0 %v2511_v3  ;;  %1711 = vmatprep.subr.bf16.mxu1 %v2514_v4  ;;  %v2538_v3 = vld [vmem:[%s3099_s14 + $0x260] ss:$12 sps:$4 sm:$0xff]  }
 0x138   : > { %v2539_v4 = vld [vmem:[%s3099_s14 + $0x20] ss:$12 sps:$4 sm:$0xff]  }
 0x13a   : > { %1671 = vmatpush1.bf16.msra.mxu0 %v2509_v5  ;;  %1712 = vmatpush1.bf16.msra.mxu1 %v2512_v6  ;;  %v2540_v5 = vld [vmem:[%s3099_s14 + $0x1a0] ss:$12 sps:$4 sm:$0xff]   ;;  %v2541_v6 = vld [vmem:[%s3099_s14 + $0xf8] ss:$12 sps:$4 sm:$0xff]  }
 0x13b   : > { %1672 = vmatprep.subr.bf16.mxu0 %v2517_v7  ;;  %1713 = vmatprep.subr.bf16.mxu1 %v2520_v8  ;;  %v2542_v7 = vld [vmem:[%s3099_s14 + $0x278] ss:$12 sps:$4 sm:$0xff]  }
 0x13c   : > { %v2543_v8 = vld [vmem:[%s3099_s14 + $0x38] ss:$12 sps:$4 sm:$0xff]  }
 0x13e   : > { %1673 = vmatpush1.bf16.msra.mxu0 %v2515_v9  ;;  %1714 = vmatpush1.bf16.msra.mxu1 %v2518_v10  ;;  %v2544_v9 = vld [vmem:[%s3099_s14 + $0x1b8] ss:$12 sps:$4 sm:$0xff]   ;;  %v2545_v10 = vld [vmem:[%s3099_s14 + $0x110] ss:$12 sps:$4 sm:$0xff]  }
 0x13f   : > { %1674 = vmatprep.subr.bf16.mxu0 %v2523_v11  ;;  %1715 = vmatprep.subr.bf16.mxu1 %v2526_v12  ;;  %v2546_v11 = vld [vmem:[%s3099_s14 + $0x290] ss:$12 sps:$4 sm:$0xff]  }
 0x140   : > { %v2547_v12 = vld [vmem:[%s3099_s14 + $0x50] ss:$12 sps:$4 sm:$0xff]  }
 0x142   : > { %1675 = vmatpush1.bf16.msra.mxu0 %v2521_v13  ;;  %1716 = vmatpush1.bf16.msra.mxu1 %v2524_v14  ;;  %v2548_v13 = vld [vmem:[%s3099_s14 + $0x1d0] ss:$12 sps:$4 sm:$0xff]   ;;  %v2549_v14 = vld [vmem:[%s3099_s14 + $0x128] ss:$12 sps:$4 sm:$0xff]  }
 0x143   : > { %1676 = vmatprep.subr.bf16.mxu0 %v2529_v15  ;;  %1717 = vmatprep.subr.bf16.mxu1 %v2532_v16  ;;  %v2550_v15 = vld [vmem:[%s3099_s14 + $0x2a8] ss:$12 sps:$4 sm:$0xff]  }
 0x144   : > { %v2551_v16 = vld [vmem:[%s3099_s14 + $0x68] ss:$12 sps:$4 sm:$0xff]  }
 0x146   : > { %1677 = vmatpush1.bf16.msra.mxu0 %v2527_v17  ;;  %1718 = vmatpush1.bf16.msra.mxu1 %v2530_v18  ;;  %v2552_v17 = vld [vmem:[%s3099_s14 + $0x1e8] ss:$12 sps:$4 sm:$0xff]   ;;  %v2553_v18 = vld [vmem:[%s3099_s14 + $0x140] ss:$12 sps:$4 sm:$0xff]  }
 0x147   : > { %2176 = vmatprep.subr.bf16.mxu0 %v2533_v19  ;;  %2198 = vmatprep.subr.bf16.mxu1 %v2534_v20  ;;  %v2554_v19 = vld [vmem:[%s3099_s14 + $0x2c0] ss:$12 sps:$4 sm:$0xff]  }
 0x148   : > { %v2555_v20 = vld [vmem:[%s3099_s14 + $0x80] ss:$12 sps:$4 sm:$0xff]  }
 0x1dc   : > { %v886_v32 = vpop.f32.mrb[0].mxu0  ;;  %v968_v33 = vpop.f32.mrb[0].mxu1 }
 0x1dd   : > { %v2220_v34 = vadd.f32 %v886_v32, %v445_v28  ;;  %v2222_v35 = vadd.f32 %v968_v33, %v453_v29  ;;  %v888_v36 = vpop.f32.mrb[1].mxu0  ;;  %v970_v37 = vpop.f32.mrb[1].mxu1  ;;  %v2559_v28 = vld [vmem:[%s3099_s14 + $0x98] ss:$12 sps:$4 sm:$0xff]   ;;  %v2563_v32 = vld [vmem:[%s3099_s14 + $0xb0] ss:$12 sps:$4 sm:$0xff]  }
 0x1de   : > { %v2221_v38 = vadd.f32 %v888_v36, %v449_v30  ;;  %v2223_v39 = vadd.f32 %v970_v37, %v457_v31  ;;  %v890_v40 = vpop.f32.mrb[2].mxu0  ;;  %v972_v41 = vpop.f32.mrb[2].mxu1  ;;  %v2560_v29 = vld [vmem:[%s3099_s14 + $0x218] ss:$12 sps:$4 sm:$0xff]   ;;  %v2561_v30 = vld [vmem:[%s3099_s14 + $0x170] ss:$12 sps:$4 sm:$0xff]  }
 0x1df   : > { %v2069_v42 = vmul.f32 -1.442695, %v2220_v34  ;;  %v2071_v43 = vmul.f32 -1.442695, %v2222_v35  ;;  %v891_v44 = vpop.f32.mrb[3].mxu0  ;;  %v973_v45 = vpop.f32.mrb[3].mxu1 }
 0x1e0   : > { %v2070_v46 = vmul.f32 -1.442695, %v2221_v38  ;;  %v2072_v47 = vmul.f32 -1.442695, %v2223_v39  ;;  %v2562_v31 = vld [vmem:[%s3099_s14 + $0x2f0] ss:$12 sps:$4 sm:$0xff]  }
 0x1e1   : > { %2565 = vpow2.f32 %v2069_v42  ;;  %v2564_v33 = vld [vmem:[%s3099_s14 + $0x230] ss:$12 sps:$4 sm:$0xff]   ;;  %v999_v35 = vld [vmem:[#allocation2] sm:$0xff] }
 0x1e2   : > { %2567 = vpow2.f32 %v2071_v43  ;;  %v1000_v39 = vld [vmem:[#allocation2 + $0x8] sm:$0xff] }
 0x1e3   : > { %2569 = vpow2.f32 %v2070_v46 }
 0x1e4   : > { %2571 = vpow2.f32 %v2072_v47 }
 0x1eb   : > { %v2566_v48 = vpop.eup %2565 }
 0x1ec   : > { %v2568_v49 = vpop.eup %2567  ;;  %v987_v50 = vadd.f32 1.0, %v2566_v48 }
 0x1ed   : > { %v2570_v51 = vpop.eup %2569  ;;  %v989_v52 = vadd.f32 1.0, %v2568_v49 }
 0x1ee   : > { %v2572_v53 = vpop.eup %2571  ;;  %2573 = vrcp.f32 %v987_v50  ;;  %v988_v54 = vadd.f32 1.0, %v2570_v51 }
 0x1ef   : > { %2575 = vrcp.f32 %v989_v52  ;;  %v990_v55 = vadd.f32 1.0, %v2572_v53 }
 0x1f0   : > { %2577 = vrcp.f32 %v988_v54 }
 0x1f1   : > { %2579 = vrcp.f32 %v990_v55 }
 0x1f8   : > { %v2574_v56 = vpop.eup %2573 }
 0x1f9   : > { %v2576_v57 = vpop.eup %2575  ;;  %v3256_v63 = vpack.c.bf16 %v2574_v56, %v2574_v56 }
 0x1fa   : > { %v2578_v58 = vpop.eup %2577  ;;  %v3259_v1 = vpack.c.bf16 %v2576_v57, %v2576_v57  ;;  %v1001_v57 = vld [vmem:[#allocation2 + $0x10] sm:$0xff] }
 0x1fb   : > { %v2580_v59 = vpop.eup %2579  ;;  %v1003_v60 = vpack.c.bf16 %v2578_v58, %v2578_v58 }
 0x1fc   : > { %v1005_v62 = vpack.c.bf16 %v2580_v59, %v2580_v59 }
 0x1fd   : > { %1678 = vmatprep.mubr.bf16.mxu0 %v1003_v60 }
 0x1fe   : > { %1719 = vmatprep.mubr.bf16.mxu1 %v1005_v62  ;;  %1679 = vmatmul.mubr.bf16.vlgmr.msra.gmra.mrb[4].mxu0 %v3256_v63 }
 0x1ff   : > { %1720 = vmatmul.mubr.bf16.vlgmr.msra.gmra.mrb[4].mxu1 %v3259_v1  ;;  %2177 = vmatpush3.bf16.msra.mxu0 %v2535_v61 }
 0x200   : > { %2199 = vmatpush3.bf16.msra.mxu1 %v2536_v0  ;;  %1760 = vmatprep.mubr.bf16.mxu0 %v1003_v60 }
 0x201   : > { %1800 = vmatprep.mubr.bf16.mxu1 %v1005_v62  ;;  %2178 = vmatprep.subr.bf16.mxu0 %v2537_v2  ;;  %v1821_v62 = vld [vmem:[#allocation11] sm:$0x7] (!%p2169_p12) }
 0x202   : > { %2200 = vmatprep.subr.bf16.mxu1 %v2538_v3  ;;  %v1826_v0 = vrot.slane (!%p2169_p12), %v1821_v62, %v444_v23  ;;  %v1834_v3 = vrot.slane (!%p2169_p12), %v1821_v62, %v452_v24 }
 0x203   : > { %2179 = vmatpush3.bf16.msra.mxu0 %v2539_v4 }
 0x204   : > { %2201 = vmatpush3.bf16.msra.mxu1 %v2540_v5  ;;  %2180 = vmatprep.subr.bf16.mxu0 %v2541_v6 }
 0x205   : > { %2202 = vmatprep.subr.bf16.mxu1 %v2542_v7 }
 0x207   : > { %2181 = vmatpush3.bf16.msra.mxu0 %v2543_v8 }
 0x208   : > { %2203 = vmatpush3.bf16.msra.mxu1 %v2544_v9  ;;  %2182 = vmatprep.subr.bf16.mxu0 %v2545_v10 }
 0x209   : > { %2204 = vmatprep.subr.bf16.mxu1 %v2546_v11 }
 0x20b   : > { %2183 = vmatpush3.bf16.msra.mxu0 %v2547_v12 }
 0x20c   : > { %2205 = vmatpush3.bf16.msra.mxu1 %v2548_v13  ;;  %2184 = vmatprep.subr.bf16.mxu0 %v2549_v14 }
 0x20d   : > { %2206 = vmatprep.subr.bf16.mxu1 %v2550_v15 }
 0x20f   : > { %2185 = vmatpush3.bf16.msra.mxu0 %v2551_v16 }
 0x210   : > { %2207 = vmatpush3.bf16.msra.mxu1 %v2552_v17  ;;  %2186 = vmatprep.subr.bf16.mxu0 %v2553_v18 }
 0x211   : > { %2208 = vmatprep.subr.bf16.mxu1 %v2554_v19 }
 0x213   : > { %2187 = vmatpush3.bf16.msra.mxu0 %v2555_v20 }
 0x214   : > { %2209 = vmatpush3.bf16.msra.mxu1 %v2556_v21  ;;  %2188 = vmatprep.subr.bf16.mxu0 %v2557_v25 }
 0x215   : > { %2210 = vmatprep.subr.bf16.mxu1 %v2558_v27 }
 0x217   : > { %2189 = vmatpush3.bf16.msra.mxu0 %v2559_v28 }
 0x218   : > { %2211 = vmatpush3.bf16.msra.mxu1 %v2560_v29  ;;  %2190 = vmatprep.subr.bf16.mxu0 %v2561_v30 }
 0x219   : > { %2212 = vmatprep.subr.bf16.mxu1 %v2562_v31 }
 0x21b   : > { %2191 = vmatpush3.bf16.msra.mxu0 %v2563_v32 }
 0x21c   : > { %2213 = vmatpush3.bf16.msra.mxu1 %v2564_v33 }
 0x21e   : > { %1761 = vmatmul.mubr.bf16.vlgmr.msra.gmra.mrb[8].mxu0 %v3256_v63 }
 0x21f   : > { %1801 = vmatmul.mubr.bf16.vlgmr.msra.gmra.mrb[8].mxu1 %v3259_v1  ;;  %v1830_v1 = vrot.slane (!%p2169_p12), %v1821_v62, %v448_v26 }
 0x2d1   : > { %v1680_v34 = vpop.f32.mrb[4].mxu0 }
 0x2d2   : > { %v1721_v36 = vpop.f32.mrb[4].mxu1  ;;  %v1682_v37 = vpop.f32.mrb[5].mxu0 }
 0x2d3   : > { %v1722_v38 = vadd.f32 %v1721_v36, %v1680_v34  ;;  %v1723_v40 = vpop.f32.mrb[5].mxu1  ;;  %v1684_v41 = vpop.f32.mrb[6].mxu0 }
 0x2d4   : > { %v1724_v42 = vadd.f32 %v1723_v40, %v1682_v37  ;;  %v1725_v43 = vpop.f32.mrb[6].mxu1  ;;  %v1685_v44 = vpop.f32.mrb[7].mxu0 }
 0x2d5   : > { %v1808_v45 = vadd.f32 %v1722_v38, %v999_v35  ;;  %v1726_v46 = vpop.f32.mrb[7].mxu1 }
 0x2d6   : > { %v1809_v47 = vadd.f32 %v1724_v42, %v1000_v39 }
 0x2d7   : > { %1811 = vst [vmem:[#allocation2] sm:$0xff] %v1808_v45 }
 0x2d8   : > { %1812 = vst [vmem:[#allocation2 + $0x8] sm:$0xff] %v1809_v47 }
 0x2de   : > { %v1818_v61 = vld [vmem:[#allocation2] sm:$0xff] (!%p2169_p12) }
 0x2df   : > { %v1819_v63 = vld [vmem:[#allocation2 + $0x8] sm:$0xff] (!%p2169_p12)  ;;  %v1838_v4 = vadd.f32 (!%p2169_p12), %v1826_v0, %v1818_v61 }
 0x2e0   : > { %v1839_v5 = vadd.f32 (!%p2169_p12), %v1830_v1, %v1819_v63 }
 0x2e1   : > { %1841 = vst [vmem:[#allocation12] sm:$0xff] (!%p2169_p12), %v1838_v4 }
 0x2e2   : > { %1842 = vst [vmem:[#allocation12 + $0x8] sm:$0xff] (!%p2169_p12), %v1839_v5 }
 0x2f1   : > { %v2192_v48 = vpop.f32.mrb[8].mxu0 }
 0x2f2   : > { %v2214_v49 = vpop.f32.mrb[8].mxu1  ;;  %v2193_v50 = vpop.f32.mrb[9].mxu0 }
 0x2f3   : > { %v2194_v51 = vadd.f32 %v2193_v50, %v2192_v48  ;;  %v2215_v52 = vpop.f32.mrb[9].mxu1  ;;  %v2195_v53 = vpop.f32.mrb[10].mxu0 }
 0x2f4   : > { %v2216_v54 = vadd.f32 %v2215_v52, %v2214_v49  ;;  %v2217_v55 = vpop.f32.mrb[10].mxu1  ;;  %v2196_v56 = vpop.f32.mrb[11].mxu0  ;;  %1817 = sbr.rel (%p2169_p12) target bundleno = 773 (0x305), region = 68 }
 0x2f5   : > { %v2218_v58 = vpop.f32.mrb[11].mxu1 }
 0x2f6   : > { %v1803_v59 = vadd.f32 %v2216_v54, %v2194_v51 }
 0x2f8   : > { %v1810_v60 = vadd.f32 %v1803_v59, %v1001_v57 }
 0x2fa   : > { %1813 = vst [vmem:[#allocation2 + $0x10] sm:$0xff] %v1810_v60 }
 0x301   : > { %v1820_v2 = vld [vmem:[#allocation2 + $0x10] sm:$0xff] }
 0x302   : > { %v1840_v6 = vadd.f32 %v1834_v3, %v1820_v2 }
 0x304   : > { %1843 = vst [vmem:[#allocation12 + $0x10] sm:$0xff] %v1840_v6 }
 0x305 PF: > { %p2277_p11 = scmp.eq.s32.totalorder %s2893_s24, 3  ;;  %s2833_s21 = smov [#allocation12]  }
 0x306   : > { %s1854_s26 = sshll.u32 %s2833_s21, 4  ;;  %s1855_s26 = int_to_ptr.vmem [resolvable:$true] %s1854_s26 }
 0x307   : > { %s2727_s8 = scalar_lea.vmem %s1855_s26, 384  ;;  %p2734_p6 = scmp.lt.s32.totalorder %s1855_s26, %s1855_s26 }
 0x308   : > { %p2728_p0 = scmp.ne.s32.totalorder %s1855_s26, %s2727_s8  ;;  %p2735_p8 = scmp.lt.s32.totalorder %s2727_s8, %s2727_s8 }
 0x30a   : > { %p2729_p7 = pnand %p2728_p0, %p2277_p11  ;;  %p2736_p13 = por %p2735_p8, %p2734_p6 }
 0x30c   : > { %p2730_p10 = pneg %p2729_p7 }
 0x30e   : > { %p2737_p3 = pnand %p2736_p13, %p2730_p10 }
 0x310   : > { %2740 = shalt.err (!%p2737_p3)
}
 0x311   : > { %s2741_s12 = scalar_lea.hbm %s3346_s5, 384 }
 0x312   : > { %p2742_p1 = scmp.ne.s32.totalorder %s3346_s5, %s2741_s12  ;;  %p2747_p5 = scmp.lt.u32.totalorder %s2741_s12, %s3346_s5 }
 0x314   : > { %p2743_p4 = pnand %p2742_p1, %p2277_p11 }
 0x316   : > { %p2744_p9 = pneg %p2743_p4 }
 0x318   : > { %p2749_p2 = pnand %p2747_p5, %p2744_p9 }
 0x31a   : > { %2752 = shalt.err (!%p2749_p2)
}
 0x31b   : > { %2252 = dma.vmem_to_hbm [thread:$0]  (%p2277_p11), %s1855_s26, 384, %s3346_s5, [#allocation5]  }
 0x31c   : > { %2794 = dma.done.wait (%p2277_p11), [#allocation5], 384  }
 0x31d   : > { %2796 = vsyncadd (%p2277_p11), [#allocation5], 4294966912 }
 0x31e PF: > { %s23_s23 = sadd.s32 1, %s2819_s23   ;;  %s3385_s15 = sld [smem:[#allocation18_spill]] }
 0x31f   : > { %p20_p12 = scmp.ge.s32.totalorder %s23_s23, 6   ;;  %s3386_s20 = sld [smem:[#allocation20_spill]] }
 0x320   : > { %s3387_s10 = sld [smem:[#allocation19_spill]]  ;;  %s3388_s18 = smov %s2803_s19 }
 0x321   : > { %s3390_s21 = smov %s2815_s22  ;;  %22 = sbr.rel (!%p20_p12) target bundleno = 11 (0xb), region = 120 }
 0x324   : > { %s3389_s19 = smov %s3385_s15 }
 0x326   : > { %s3391_s22 = smov %s3387_s10 }
 0x328   :  { %1867 = vsyncpa [#allocation4], 1 }
 0x329   :  { %1869 = vsyncpa [#allocation4 + $0x1], 1 }
 0x32a   :  { %1870 = vsyncpa [#allocation7], 1 }
 0x32b   :  { %1872 = vsyncpa [#allocation7 + $0x1], 1 }
 0x32c   :  { %1873 = vsyncpa [#allocation10], 1 }
 0x32d   :  { %1875 = vsyncpa [#allocation10 + $0x1], 1 }
 0x32e   :  { %1876 = vsyncpa [#allocation5], 1 }
 0x32f   :  { %1878 = vsyncpa [#allocation5 + $0x1], 1 }

</bundles_post_ra>
